<compile_context>
chip_gen: v6e
topology: v6e:2x2x1
jax: 0.10.0
libtpu: 0.0.40
codegen_flags: <defaults>
</compile_context>

<pallas_src>
import numpy as np
import jax
import jax.numpy as jnp
from jax.experimental import pallas as pl
from jax.experimental.pallas import tpu as pltpu


def _round_up(x, m):
    return (x + m - 1) // m * m


# ------------------------------ Pallas kernel -------------------------------

def _conv_bias_kernel(mat_ref, w_ref, b_ref, o_ref):
    # mat: (tile_n, K_pad)   w: (K_pad, tile_co)   b: (1, tile_co)
    # o  : (tile_co, tile_n) -- NCW output tile (transposed in-kernel, XLU slot)
    y = jnp.dot(mat_ref[...], w_ref[...], preferred_element_type=jnp.float32)
    o_ref[...] = (y + b_ref[...]).T


# ------------------------------- JAX wrapper ---------------------------------

def onering_conv_batch(x, neigh_orders, w, b, *, tile_n=256, tile_co=512,
                       compute_dtype=jnp.float32):
    """x: (B, C_in, N); neigh_orders: (7N,) int; w: (7*C_in, C_out); b: (C_out,).
    Returns (B, C_out, N) float32 (same layout as the PyTorch module)."""
    B, C_in, N = x.shape
    K = 7 * C_in
    C_out = w.shape[1]

    # im2col gather, channel-last, at compute precision (halves gather bytes
    # for bf16).  Row layout per node is [neighbor k, channel c], c fastest ->
    # identical to the PyTorch (B, N, 7, C_in) flatten.
    x_nl = jnp.transpose(x, (0, 2, 1)).astype(compute_dtype)   # (B, N, C_in)
    mat = jnp.take(x_nl, neigh_orders, axis=1)                 # (B, 7N, C_in)
    mat = mat.reshape(B, N, K)                                 # (B, N, 7*C_in)

    # Lane/sublane-friendly tile sizes and padding.
    tile_n = max(128, _round_up(tile_n, 128))
    tile_n = min(tile_n, _round_up(N, 128))
    tile_co = max(128, _round_up(tile_co, 128))

    K_pad = _round_up(K, 128)
    N_pad = _round_up(N, tile_n)
    C_out_pad = _round_up(C_out, 128)
    tile_co = min(tile_co, C_out_pad)
    C_out_pad = _round_up(C_out_pad, tile_co)

    mat_p = jnp.pad(mat, ((0, 0), (0, N_pad - N), (0, K_pad - K)))
    w_p = jnp.pad(w, ((0, K_pad - K), (0, C_out_pad - C_out))).astype(compute_dtype)
    b_p = jnp.pad(b.astype(jnp.float32).reshape(1, C_out),
                  ((0, 0), (0, C_out_pad - C_out)))

    grid = (B, C_out_pad // tile_co, N_pad // tile_n)   # node tiles innermost
    bpe = np.dtype(compute_dtype).itemsize
    bytes_accessed = (B * N_pad * K_pad * bpe * grid[1]   # im2col rows (re-read per C_out tile)
                      + B * K_pad * C_out_pad * bpe       # weights (resident over node loop)
                      + C_out_pad * 4                     # bias
                      + B * C_out_pad * N_pad * 4)        # output (written once, already NCW)

    out = pl.pallas_call(
        _conv_bias_kernel,
        out_shape=jax.ShapeDtypeStruct((B, C_out_pad, N_pad), jnp.float32),
        grid=grid,
        in_specs=[
            pl.BlockSpec((None, tile_n, K_pad), lambda bb, j, i: (bb, i, 0)),  # im2col rows
            pl.BlockSpec((K_pad, tile_co),      lambda bb, j, i: (0, j)),      # weights
            pl.BlockSpec((1, tile_co),          lambda bb, j, i: (0, j)),      # bias row
        ],
        out_specs=pl.BlockSpec((None, tile_co, tile_n), lambda bb, j, i: (bb, j, i)),
        compiler_params=pltpu.CompilerParams(
            dimension_semantics=("parallel", "parallel", "parallel"),
            vmem_limit_bytes=32 * 1024 * 1024,   # safe on v5e/v6e/v7x; default tiles fit
        ),
        cost_estimate=pl.CostEstimate(
            flops=2 * B * N_pad * K_pad * C_out_pad,
            transcendentals=0,
            bytes_accessed=bytes_accessed,
        ),
    )(mat_p, w_p, b_p)

    return out[:, :C_out, :N]                   # drop padding; already (B, C_out, N)


# ---------------------------- pure-JAX reference -----------------------------

def _ref_onering_conv(x, neigh, w, b):
    B, C, N = x.shape
    mat = x[:, :, neigh].reshape(B, C, N, 7).transpose(0, 2, 3, 1).reshape(B, N, 7 * C)
    return jnp.transpose(mat @ w + b, (0, 2, 1))


# ----------------------------------- main ------------------------------------

if __name__ == "__main__":
    key = jax.random.PRNGKey(0)
    ks = jax.random.split(key, 4)

    B, in_ch, out_ch, N = 2, 4, 8, 162           # icosphere level-2: 162 nodes
    x = jax.random.normal(ks[0], (B, in_ch, N), jnp.float32)
    # synthetic deterministic one-ring neighbor table (7 neighbors per node)
    neigh_orders = jax.random.randint(ks[1], (7 * N,), 0, N, jnp.int32)
    # Linear(7*in_ch, out_ch): weight stored transposed as (7*in_ch, out_ch)
    w = jax.random.normal(ks[2], (7 * in_ch, out_ch), jnp.float32) * 0.1
    b = jax.random.normal(ks[3], (out_ch,), jnp.float32) * 0.1

    ref = _ref_onering_conv(x, neigh_orders, w, b)

    # f32 path (matches PyTorch Linear numerics); tile_n=128 so the grid has
    # multiple node tiles at this size (N=162 -> N_pad=256 -> 2 tiles/batch).
    out = jax.block_until_ready(
        onering_conv_batch(x, neigh_orders, w, b, tile_n=128,
                           compute_dtype=jnp.float32))
    assert out.shape == (B, out_ch, N), out.shape
    np.testing.assert_allclose(np.asarray(out), np.asarray(ref),
                               rtol=1e-4, atol=1e-4)

    # bf16-operand path (prod setting: 2x MXU throughput, f32 accumulation).
    out_bf16 = jax.block_until_ready(
        onering_conv_batch(x, neigh_orders, w, b, tile_n=128,
                           compute_dtype=jnp.bfloat16))
    np.testing.assert_allclose(np.asarray(out_bf16), np.asarray(ref),
                               rtol=3e-2, atol=3e-2)

    print("KERNEL_OK")
</pallas_src>

<mosaic_0001>
module attributes {stable_mosaic.version = 11 : i64} {
  func.func @_conv_bias_kernel(%arg0: i32, %arg1: i32, %arg2: i32, %arg3: memref<1x128x128xf32, #tpu.memory_space<vmem>>, %arg4: memref<128x128xf32, #tpu.memory_space<vmem>>, %arg5: memref<1x128xf32, #tpu.memory_space<vmem>>, %arg6: memref<1x128x128xf32, #tpu.memory_space<vmem>>) attributes {dimension_semantics = [#tpu.dimension_semantics<parallel>, #tpu.dimension_semantics<parallel>, #tpu.dimension_semantics<parallel>], iteration_bounds = array<i64: 2, 1, 2>, scalar_prefetch = 0 : i64, scratch_operands = 0 : i64, tpu.core_type = #tpu.core_type<tc>, window_params = [{transform_indices = @transform_0, window_bounds = array<i64: 1, 128, 128>}, {transform_indices = @transform_1, window_bounds = array<i64: 128, 128>}, {transform_indices = @transform_2, window_bounds = array<i64: 1, 128>}, {transform_indices = @transform_3, window_bounds = array<i64: 1, 128, 128>}]} {
    %c0 = arith.constant 0 : index
    %c0_0 = arith.constant 0 : index
    %c0_1 = arith.constant 0 : index
    %0 = vector.load %arg3[%c0, %c0_0, %c0_1] : memref<1x128x128xf32, #tpu.memory_space<vmem>>, vector<1x128x128xf32>
    %1 = vector.shape_cast %0 : vector<1x128x128xf32> to vector<128x128xf32>
    %c0_2 = arith.constant 0 : index
    %c0_3 = arith.constant 0 : index
    %2 = vector.load %arg4[%c0_2, %c0_3] : memref<128x128xf32, #tpu.memory_space<vmem>>, vector<128x128xf32>
    %cst = arith.constant dense<0.000000e+00> : vector<128x128xf32>
    %3 = tpu.matmul %1, %2, %cst {dimension_numbers = #tpu.dot_dimension_numbers<[1], [0], [0], [1], [0, 0, 1, 1], [], []>} : vector<128x128xf32>, vector<128x128xf32>, vector<128x128xf32> -> vector<128x128xf32>
    %c0_4 = arith.constant 0 : index
    %c0_5 = arith.constant 0 : index
    %4 = vector.load %arg5[%c0_4, %c0_5] : memref<1x128xf32, #tpu.memory_space<vmem>>, vector<1x128xf32>
    %5 = vector.broadcast %4 : vector<1x128xf32> to vector<128x128xf32>
    %6 = arith.addf %3, %5 : vector<128x128xf32>
    %7 = tpu.transpose %6, [1, 0] : vector<128x128xf32> -> vector<128x128xf32>
    %c0_6 = arith.constant 0 : index
    %c0_7 = arith.constant 0 : index
    %c0_8 = arith.constant 0 : index
    %8 = vector.load %arg6[%c0_6, %c0_7, %c0_8] : memref<1x128x128xf32, #tpu.memory_space<vmem>>, vector<1x128x128xf32>
    %9 = vector.shape_cast %8 : vector<1x128x128xf32> to vector<128x128xf32>
    %10 = vector.shape_cast %7 : vector<128x128xf32> to vector<1x128x128xf32>
    tpu.vector_store %arg6[%c0_6, %c0_7, %c0_8], %10 {strides = array<i32>} : memref<1x128x128xf32, #tpu.memory_space<vmem>>, vector<1x128x128xf32>,
    return
  }
  func.func @transform_0(%arg0: i32, %arg1: i32, %arg2: i32) -> (i32, i32, i32) {
    %c0_i32 = arith.constant 0 : i32
    %c0_i32_0 = arith.constant 0 : i32
    return %arg0, %arg2, %c0_i32 : i32, i32, i32
  }
  func.func @transform_1(%arg0: i32, %arg1: i32, %arg2: i32) -> (i32, i32) {
    %c0_i32 = arith.constant 0 : i32
    %c0_i32_0 = arith.constant 0 : i32
    return %c0_i32, %arg1 : i32, i32
  }
  func.func @transform_2(%arg0: i32, %arg1: i32, %arg2: i32) -> (i32, i32) {
    %c0_i32 = arith.constant 0 : i32
    %c0_i32_0 = arith.constant 0 : i32
    return %c0_i32, %arg1 : i32, i32
  }
  func.func @transform_3(%arg0: i32, %arg1: i32, %arg2: i32) -> (i32, i32, i32) {
    %c0_i32 = arith.constant 0 : i32
    return %arg0, %arg1, %arg2 : i32, i32, i32
  }
}

</mosaic_0001>

<bundles_post_ra>
// kernel: tpu_custom_call.1
= control target key start
LH: loop header
LB: loop body
LE: loop exit
PB: predicated region body
PF: predicated region fallthrough
CT: control target
= control target key end

     0   :  { %s1287_s0 = inlined_call_operand.hbm [shape: f32[2,256,128], index: 0, kind: input, shape index: {}]   ;;  %s1288_s1 = inlined_call_operand.hbm [shape: f32[128,128], index: 1, kind: input, shape index: {}]   ;;  %s1289_s2 = inlined_call_operand.vmem [shape: f32[1,128], index: 2, kind: input, shape index: {}]   ;;  %s1290_s3 = inlined_call_operand.hbm [shape: f32[2,128,256], index: 3, kind: output, shape index: {}]  }
   0x1   :  { %1298 = sst [smem:[#allocation15_spill]] %s1288_s1 }
   0x2   :  { %8 = vsyncpa [#allocation3], 0 }
   0x3   :  { %10 = vsyncpa [#allocation3 + $0x1], 0 }
   0x4   :  { %11 = vsyncpa [#allocation6], 0 }
   0x5   :  { %12 = vsyncpa [#allocation4], 0 }
   0x6   :  { %14 = vsyncpa [#allocation4 + $0x1], 0  ;;  %s1040_s12 = smov 0   ;;  %s1042_s13 = smov 0  }
   0x7   :  { %s1044_s14 = smov 0   ;;  %s1046_s15 = smov 0  }
   0x8   :  { %s1048_s16 = smov 0   ;;  %s1050_s17 = smov 0  }
   0x9   :  { %s1052_s18 = smov 0   ;;  %s1054_s19 = smov 0  }
   0xa LB: > { %1299 = sst [smem:[#allocation11_spill]] %s982_s12  ;;  %s622_s20 = sadd.s32 4294967295, %s1010_s19   ;;  %s1010_s19 = sphi %s1054_s19, %s20_s19   ;;  %s1006_s18 = sphi %s1052_s18, %s1324_s18   ;;  %s1002_s17 = sphi %s1050_s17, %s1319_s17   ;;  %s998_s16 = sphi %s1048_s16, %s1323_s16   ;;  %s994_s15 = sphi %s1046_s15, %s1318_s15   ;;  %s990_s14 = sphi %s1044_s14, %s1322_s14   ;;  %s986_s13 = sphi %s1042_s13, %s1321_s13   ;;  %s982_s12 = sphi %s1040_s12, %s1320_s12  }
   0xb   : > { %1300 = sst [smem:[#allocation12_spill]] %s1002_s17  ;;  %s623_s21 = sadd.s32 4294967294, %s1010_s19  }
   0xc   : > { %p61_p0 = scmp.ne.s32.totalorder %s986_s13, %s982_s12  ;;  %p1084_p1 = scmp.eq.s32.totalorder %s622_s20, 0 }
   0xd   : > { %p1088_p2 = scmp.eq.s32.totalorder %s622_s20, 3  ;;  %p147_p3 = scmp.eq.s32.totalorder %s623_s21, 3 }
   0xe   : > { %p1094_p4 = por %p1084_p1, %p61_p0  ;;  %p624_p5 = scmp.ge.s32.totalorder %s1010_s19, 1 }
   0xf   : > { %p1099_p6 = por %p147_p3, %p61_p0  ;;  %p154_p7 = scmp.lt.s32.totalorder %s1010_s19, 5 }
  0x10   : > { %s1303_s24 = scalar_select %p1094_p4, 1, 0 }
  0x11   : > { %s1304_s25 = scalar_select %p1099_p6, 1, 0 }
  0x12   : > { %p1104_p8 = pnand %p624_p5, %p154_p7  ;;  %s1012_s27 = smov [#allocation5]  }
  0x13   : > { %1305 = sst [smem:[#allocation13_spill]] %s1304_s25  ;;  %s168_s28 = sshll.u32 %s1012_s27, 4  ;;  %s169_s28 = int_to_ptr.vmem [resolvable:$true] %s168_s28 }
  0x14   : > { %p770_p9 = pneg %p1104_p8  ;;  %s867_s29 = scalar_lea.vmem %s169_s28, 2048 }
  0x15   : > { %p868_p12 = scmp.ne.s32.totalorder %s169_s28, %s867_s29  ;;  %p875_p3 = scmp.lt.s32.totalorder %s169_s28, %s169_s28 }
  0x16   : > { %p771_p10 = pnand %p770_p9, %p1084_p1  ;;  %p876_p6 = scmp.lt.s32.totalorder %s867_s29, %s867_s29 }
  0x18   : > { %p858_p11 = pneg %p771_p10  ;;  %p877_p4 = por %p876_p6, %p875_p3 }
  0x1a   : > { %p870_p13 = pnand %p868_p12, %p858_p11 }
  0x1c   : > { %p871_p0 = pneg %p870_p13 }
  0x1e   : > { %p878_p5 = pnand %p877_p4, %p871_p0 }
  0x20   : > { %881 = shalt.err (!%p878_p5)
}
  0x21   : > { %s1292_s30 = smov 128   ;;  %s1293_s4 = smov 8  }
  0x22   : > { %s1307_s1 = sld [smem:[#allocation15_spill]]  ;;  %s32_s7 = sadd.s32 1, %s1002_s17 }
  0x23   : > { %p33_p4 = scmp.ge.s32.totalorder %s32_s7, 2  ;;  %s39_s8 = sadd.s32 1, %s1006_s18 }
  0x24   : > { %s48_s9 = sadd.s32 1, %s990_s14  ;;  %p55_p6 = scmp.ne.s32.totalorder %s990_s14, %s986_s13 }
  0x25   : > { %s1326_s7 = smov (%p33_p4, %s32_s7), 0  ;;  %s1328_s8 = smov (!%p33_p4, %s39_s8), %s1006_s18 }
  0x26   : > { %1308 = sst [smem:[#allocation14_spill]] %s1326_s7  ;;  %s44_s10 = ssub.s32 %s1002_s17, %s1326_s7 }
  0x27   : > { %p56_p7 = scmp.eq.s32.totalorder %s1010_s19, 0  ;;  %p41_p9 = scmp.ge.s32.totalorder %s1328_s8, 2 }
  0x28   : > { %773 = dma.hbm_to_vmem [thread:$0]  (!%p771_p10), %s1307_s1, 2048, %s169_s28, [#allocation6], %s1292_s30, %s1292_s30, %s1293_s4  }
  0x29   : > { %p1131_p11 = por %p1088_p2, %p55_p6  ;;  %p1135_p10 = por %p56_p7, %p55_p6 }
  0x2a   : > { %p783_p12 = scmp.lt.s32.totalorder %s1010_s19, 4  ;;  %s1330_s8 = smov (%p41_p9, %s1328_s8), 0 }
  0x2b   : > { %s188_s21 = sand.u32 1, %s990_s14   ;;  %s629_s27 = sshll.u32 %s1002_s17, 4 }
  0x2c   : > { %s43_s28 = ssub.s32 %s1006_s18, %s1330_s8  ;;  %s628_s5 = sshll.u32 %s188_s21, 7 }
  0x2d   : > { %s45_s29 = sor.u32 %s44_s10, %s43_s28  ;;  %s630_s23 = sshll.u32 %s1006_s18, 5 }
  0x2e   : > { %p46_p13 = scmp.eq.s32.totalorder %s45_s29, 0  ;;  %s192_s6 = scalar_lea.vmem [#allocation2], %s628_s5 }
  0x2f   : > { %s201_s30 = sshll.u32 %s192_s6, 4  ;;  %s198_s1 = sadd.s32 %s630_s23, %s629_s27  ;;  %s202_s30 = int_to_ptr.vmem [resolvable:$true] %s201_s30 }
  0x30   : > { %s1148_s4 = scalar_select %p46_p13, %s990_s14, %s48_s9  }
  0x31   : > { %s631_s7 = sshll.u32 %s198_s1, 7  ;;  %p1154_p2 = pnand %p783_p12, %p1135_p10 }
  0x32   : > { %s200_s10 = scalar_lea.hbm %s1287_s0, %s631_s7  ;;  %s189_s28 = scalar_lea.sflag [#allocation3], %s188_s21 }
  0x33   : > { %p884_p0 = pneg %p1154_p2  ;;  %s895_s29 = scalar_lea.vmem %s202_s30, 2048 }
  0x34   : > { %p896_p3 = scmp.ne.s32.totalorder %s202_s30, %s895_s29  ;;  %s1015_s9 = smov [#allocation2]  }
  0x35   : > { %s900_s1 = sshll.u32 %s1015_s9, 4  ;;  %s901_s1 = int_to_ptr.vmem [resolvable:$false] %s900_s1 }
  0x36   : > { %p898_p5 = pnand %p896_p3, %p884_p0  ;;  %s902_s20 = scalar_lea.vmem %s901_s1, 4096 }
  0x37   : > { %p903_p6 = scmp.lt.s32.totalorder %s202_s30, %s901_s1  ;;  %p904_p7 = scmp.lt.s32.totalorder %s902_s20, %s895_s29 }
  0x38   : > { %p899_p4 = pneg %p898_p5 }
  0x39   : > { %p905_p9 = por %p904_p7, %p903_p6 }
  0x3b   : > { %p906_p10 = pnand %p905_p9, %p899_p4 }
  0x3d   : > { %909 = shalt.err (!%p906_p10)
}
  0x3e   : > { %s1312_s12 = smov 8   ;;  %s1313_s17 = smov 128  }
  0x3f   : > { %777 = dma.hbm_to_vmem [thread:$0]  (!%p1154_p2), %s200_s10, 2048, %s202_s30, %s189_s28, %s1313_s17, %s1313_s17, %s1312_s12  }
  0x40   : > { %213 = sbr.rel (%p1104_p8) target bundleno = 502 (0x1f6), region = 32  ;;  %s1171_s7 = sand.u32 (!%p1104_p8), 1, %s986_s13  }
  0x41   : > { %s633_s21 = sshll.u32 (!%p1104_p8), %s1171_s7, 7  ;;  %s216_s27 = scalar_lea.sflag (!%p1104_p8), [#allocation3], %s1171_s7 }
  0x42   : > { %s1177_s5 = scalar_lea.vmem (!%p1104_p8), [#allocation2], %s633_s21  ;;  %p1314_p12 = scmp.ne.s32.totalorder (!%p1104_p8), %s1303_s24, 0 }
  0x45   : > { %969 = dma.done.wait (%p1314_p12), %s216_s27, 2048  }
  0x46   : > { %971 = vsyncadd (%p1314_p12), %s216_s27, 4294965248 }
  0x47   : > { %973 = dma.done.wait (%p1084_p1), [#allocation6], 2048  }
  0x48   : > { %975 = vsyncadd (%p1084_p1), [#allocation6], 4294965248  ;;  %v285_v0 = vld [vmem:[#allocation5 + $0x78] sm:$0xff]  ;;  %v284_v1 = vld [vmem:[#allocation5 + $0x70] sm:$0xff]  ;;  %s1208_s25 = scalar_lea.vmem [#allocation7], %s633_s21  ;;  %s638_s26 = sshll.u32 %s998_s16, 5 }
  0x49   : > { %674 = vmatprep.subr.mxu0 %v285_v0  ;;  %730 = vmatprep.subr.mxu1 %v285_v0  ;;  %v283_v2 = vld [vmem:[#allocation5 + $0x68] sm:$0xff]  ;;  %v282_v3 = vld [vmem:[#allocation5 + $0x60] sm:$0xff]  ;;  %v281_v5 = vld [vmem:[#allocation5 + $0x58] sm:$0xff]  ;;  %s501_s30 = sadd.s32 %s994_s15, %s638_s26  ;;  %s504_s6 = sshll.u32 %s1208_s25, 4  ;;  %s1233_s6 = int_to_ptr.vmem [resolvable:$true] %s504_s6 }
  0x4a   : > { %675 = vmatpush3.msra.mxu0 %v285_v0  ;;  %746 = vmatpush3.msra.mxu1 %v285_v0  ;;  %v254_v4 = vld [vmem:[%s1177_s5] sm:$0xff]  ;;  %v280_v6 = vld [vmem:[#allocation5 + $0x50] sm:$0xff]  ;;  %v279_v7 = vld [vmem:[#allocation5 + $0x48] sm:$0xff]  ;;  %s639_s23 = sshll.u32 %s501_s30, 7  ;;  %s487_s16 = scalar_lea.sflag [#allocation4], %s1171_s7 }
  0x4b   : > { %676 = vmatprep.subr.mxu0 %v284_v1  ;;  %731 = vmatprep.subr.mxu1 %v284_v1  ;;  %v278_v8 = vld [vmem:[#allocation5 + $0x40] sm:$0xff]  ;;  %v277_v9 = vld [vmem:[#allocation5 + $0x38] sm:$0xff]  ;;  %v276_v10 = vld [vmem:[#allocation5 + $0x30] sm:$0xff]  ;;  %s1231_s29 = scalar_lea.hbm %s1290_s3, %s639_s23  ;;  %s910_s15 = scalar_lea.vmem %s1233_s6, 2048 }
  0x4c   : > { %677 = vmatpush3.msra.mxu0 %v284_v1  ;;  %747 = vmatpush3.msra.mxu1 %v284_v1  ;;  %v275_v11 = vld [vmem:[#allocation5 + $0x28] sm:$0xff]  ;;  %v274_v12 = vld [vmem:[#allocation5 + $0x20] sm:$0xff]  ;;  %v273_v13 = vld [vmem:[#allocation5 + $0x18] sm:$0xff]  ;;  %p911_p1 = scmp.ne.s32.totalorder %s1233_s6, %s910_s15  ;;  %s1016_s9 = smov [#allocation7]  }
  0x4d   : > { %678 = vmatprep.subr.mxu0 %v283_v2  ;;  %732 = vmatprep.subr.mxu1 %v283_v2  ;;  %v272_v14 = vld [vmem:[#allocation5 + $0x10] sm:$0xff]  ;;  %v271_v15 = vld [vmem:[#allocation5 + $0x8] sm:$0xff]  ;;  %v270_v16 = vld [vmem:[#allocation5] sm:$0xff]  ;;  %s914_s1 = sshll.u32 %s1016_s9, 4  ;;  %s915_s1 = int_to_ptr.vmem [resolvable:$false] %s914_s1 }
  0x4e   : > { %679 = vmatpush3.msra.mxu0 %v283_v2  ;;  %706 = vmatprep.mubr.f32.mxu0 %v254_v4  ;;  %v255_v17 = vld [vmem:[%s1177_s5 + $0x8] sm:$0xff]  ;;  %v256_v18 = vld [vmem:[%s1177_s5 + $0x10] sm:$0xff]  ;;  %v262_v19 = vld [vmem:[%s1177_s5 + $0x40] sm:$0xff]  ;;  %p912_p8 = pnand %p911_p1, %p1131_p11  ;;  %s916_s20 = scalar_lea.vmem %s915_s1, 4096 }
  0x4f   : > { %680 = vmatprep.subr.mxu0 %v282_v3  ;;  %748 = vmatpush3.msra.mxu1 %v283_v2  ;;  %v263_v20 = vld [vmem:[%s1177_s5 + $0x48] sm:$0xff]  ;;  %v264_v21 = vld [vmem:[%s1177_s5 + $0x50] sm:$0xff]  ;;  %v257_v22 = vld [vmem:[%s1177_s5 + $0x18] sm:$0xff]  ;;  %p917_p2 = scmp.lt.s32.totalorder %s1233_s6, %s915_s1  ;;  %p918_p0 = scmp.lt.s32.totalorder %s916_s20, %s910_s15 }
  0x50   : > { %681 = vmatpush3.msra.mxu0 %v282_v3  ;;  %733 = vmatprep.subr.mxu1 %v282_v3  ;;  %v258_v23 = vld [vmem:[%s1177_s5 + $0x20] sm:$0xff]  ;;  %v265_v24 = vld [vmem:[%s1177_s5 + $0x58] sm:$0xff]  ;;  %v259_v26 = vld [vmem:[%s1177_s5 + $0x28] sm:$0xff]  ;;  %p913_p13 = pneg %p912_p8 }
  0x51   : > { %682 = vmatprep.subr.mxu0 %v281_v5  ;;  %749 = vmatpush3.msra.mxu1 %v282_v3  ;;  %v266_v25 = vld [vmem:[%s1177_s5 + $0x60] sm:$0xff]  ;;  %v260_v27 = vld [vmem:[%s1177_s5 + $0x30] sm:$0xff]  ;;  %v267_v28 = vld [vmem:[%s1177_s5 + $0x68] sm:$0xff]  ;;  %p919_p3 = por %p918_p0, %p917_p2 }
  0x52   : > { %683 = vmatpush3.msra.mxu0 %v281_v5  ;;  %734 = vmatprep.subr.mxu1 %v281_v5  ;;  %v268_v29 = vld [vmem:[%s1177_s5 + $0x70] sm:$0xff]  ;;  %v261_v30 = vld [vmem:[%s1177_s5 + $0x38] sm:$0xff]  ;;  %v636_v33 = vld [vmem:[%s1289_s2] ss:$0 sm:$0xff] }
  0x53   : > { %684 = vmatprep.subr.mxu0 %v280_v6  ;;  %750 = vmatpush3.msra.mxu1 %v281_v5  ;;  %v269_v31 = vld [vmem:[%s1177_s5 + $0x78] sm:$0xff]  ;;  %p920_p5 = pnand %p919_p3, %p913_p13 }
  0x54   : > { %685 = vmatpush3.msra.mxu0 %v280_v6  ;;  %735 = vmatprep.subr.mxu1 %v280_v6 }
  0x55   : > { %686 = vmatprep.subr.mxu0 %v279_v7  ;;  %751 = vmatpush3.msra.mxu1 %v280_v6 }
  0x56   : > { %687 = vmatpush3.msra.mxu0 %v279_v7  ;;  %736 = vmatprep.subr.mxu1 %v279_v7 }
  0x57   : > { %688 = vmatprep.subr.mxu0 %v278_v8  ;;  %752 = vmatpush3.msra.mxu1 %v279_v7 }
  0x58   : > { %689 = vmatpush3.msra.mxu0 %v278_v8  ;;  %737 = vmatprep.subr.mxu1 %v278_v8 }
  0x59   : > { %690 = vmatprep.subr.mxu0 %v277_v9  ;;  %753 = vmatpush3.msra.mxu1 %v278_v8 }
  0x5a   : > { %691 = vmatpush3.msra.mxu0 %v277_v9  ;;  %738 = vmatprep.subr.mxu1 %v277_v9 }
  0x5b   : > { %692 = vmatprep.subr.mxu0 %v276_v10  ;;  %754 = vmatpush3.msra.mxu1 %v277_v9 }
  0x5c   : > { %693 = vmatpush3.msra.mxu0 %v276_v10  ;;  %739 = vmatprep.subr.mxu1 %v276_v10 }
  0x5d   : > { %694 = vmatprep.subr.mxu0 %v275_v11  ;;  %755 = vmatpush3.msra.mxu1 %v276_v10 }
  0x5e   : > { %695 = vmatpush3.msra.mxu0 %v275_v11  ;;  %740 = vmatprep.subr.mxu1 %v275_v11 }
  0x5f   : > { %696 = vmatprep.subr.mxu0 %v274_v12  ;;  %756 = vmatpush3.msra.mxu1 %v275_v11 }
  0x60   : > { %697 = vmatpush3.msra.mxu0 %v274_v12  ;;  %741 = vmatprep.subr.mxu1 %v274_v12 }
  0x61   : > { %698 = vmatprep.subr.mxu0 %v273_v13  ;;  %757 = vmatpush3.msra.mxu1 %v274_v12 }
  0x62   : > { %699 = vmatpush3.msra.mxu0 %v273_v13  ;;  %742 = vmatprep.subr.mxu1 %v273_v13 }
  0x63   : > { %700 = vmatprep.subr.mxu0 %v272_v14  ;;  %758 = vmatpush3.msra.mxu1 %v273_v13 }
  0x64   : > { %701 = vmatpush3.msra.mxu0 %v272_v14  ;;  %743 = vmatprep.subr.mxu1 %v272_v14 }
  0x65   : > { %702 = vmatprep.subr.mxu0 %v271_v15  ;;  %759 = vmatpush3.msra.mxu1 %v272_v14 }
  0x66   : > { %703 = vmatpush3.msra.mxu0 %v271_v15  ;;  %744 = vmatprep.subr.mxu1 %v271_v15 }
  0x67   : > { %704 = vmatprep.subr.mxu0 %v270_v16  ;;  %760 = vmatpush3.msra.mxu1 %v271_v15 }
  0x68   : > { %705 = vmatpush3.msra.mxu0 %v270_v16  ;;  %745 = vmatprep.subr.mxu1 %v270_v16 }
  0x69   : > { %707 = vmatmul.mubr.f32.vlgmr.msra.gmra.mxu0 %v255_v17  ;;  %761 = vmatpush3.msra.mxu1 %v270_v16 }
  0x6a   : > { %709 = vmatprep.mubr.f32.mxu0 %v256_v18  ;;  %718 = vmatprep.mubr.f32.mxu1 %v262_v19 }
  0x6b   : > { %719 = vmatmul.mubr.f32.vlgmr.msra.gmra.mxu1 %v263_v20 }
  0x6c   : > { %721 = vmatprep.mubr.f32.mxu1 %v264_v21 }
  0x6d   : > { %710 = vmatmul.mubr.f32.gmra.mxu0 %v257_v22 }
  0x6e   : > { %712 = vmatprep.mubr.f32.mxu0 %v258_v23 }
  0x6f   : > { %722 = vmatmul.mubr.f32.gmra.mxu1 %v265_v24 }
  0x70   : > { %724 = vmatprep.mubr.f32.mxu1 %v266_v25 }
  0x71   : > { %713 = vmatmul.mubr.f32.gmra.mxu0 %v259_v26 }
  0x72   : > { %715 = vmatprep.mubr.f32.mxu0 %v260_v27 }
  0x73   : > { %725 = vmatmul.mubr.f32.gmra.mxu1 %v267_v28 }
  0x74   : > { %727 = vmatprep.mubr.f32.mxu1 %v268_v29 }
  0x75   : > { %716 = vmatmul.mubr.f32.gmra.mxu0 %v261_v30 }
  0x77   : > { %728 = vmatmul.mubr.f32.gmra.mxu1 %v269_v31 }
 0x129   : > { %v708_v32 = vpop.f32.mrf.mxu0 }
 0x12a   : > { %v365_v37 = vadd.f32 %v708_v32, %v636_v33 }
 0x12b   : > { %v359_v34 = vpop.f32.mrf.mxu0  ;;  %v720_v48 = vpop.f32.mrf.mxu1 }
 0x12c   : > { %v360_v35 = vadd.f32 %v636_v33, %v359_v34  ;;  %v405_v53 = vadd.f32 %v720_v48, %v636_v33 }
 0x12d   : > { %v711_v36 = vpop.f32.mrf.mxu0  ;;  %v399_v50 = vpop.f32.mrf.mxu1 }
 0x12e   : > { %438 = vxpose.xlu0.b32.start [1/16] %v360_v35, 128  ;;  %v375_v41 = vadd.f32 %v711_v36, %v636_v33  ;;  %v400_v51 = vadd.f32 %v636_v33, %v399_v50 }
 0x12f   : > { %v369_v38 = vpop.f32.mrf.mxu0  ;;  %v723_v52 = vpop.f32.mrf.mxu1 }
 0x130   : > { %v370_v39 = vadd.f32 %v636_v33, %v369_v38  ;;  %v415_v57 = vadd.f32 %v723_v52, %v636_v33 }
 0x131   : > { %v714_v40 = vpop.f32.mrf.mxu0  ;;  %v409_v54 = vpop.f32.mrf.mxu1 }
 0x132   : > { %439 = vxpose.xlu0.b32.cont [2/16] %v365_v37, 128  ;;  %v385_v45 = vadd.f32 %v714_v40, %v636_v33  ;;  %v410_v55 = vadd.f32 %v636_v33, %v409_v54 }
 0x133   : > { %v379_v42 = vpop.f32.mrf.mxu0  ;;  %v726_v56 = vpop.f32.mrf.mxu1 }
 0x134   : > { %v380_v43 = vadd.f32 %v636_v33, %v379_v42  ;;  %v425_v61 = vadd.f32 %v726_v56, %v636_v33 }
 0x135   : > { %v717_v44 = vpop.f32.mrf.mxu0  ;;  %v419_v58 = vpop.f32.mrf.mxu1 }
 0x136   : > { %440 = vxpose.xlu0.b32.cont [3/16] %v370_v39, 128  ;;  %v395_v49 = vadd.f32 %v717_v44, %v636_v33  ;;  %v420_v59 = vadd.f32 %v636_v33, %v419_v58 }
 0x137   : > { %v389_v46 = vpop.f32.mrf.mxu0  ;;  %v729_v60 = vpop.f32.mrf.mxu1 }
 0x138   : > { %v390_v47 = vadd.f32 %v636_v33, %v389_v46  ;;  %v435_v0 = vadd.f32 %v729_v60, %v636_v33 }
 0x139   : > { %v429_v62 = vpop.f32.mrf.mxu1 }
 0x13a   : > { %441 = vxpose.xlu0.b32.cont [4/16] %v375_v41, 128  ;;  %v430_v63 = vadd.f32 %v636_v33, %v429_v62 }
 0x13e   : > { %442 = vxpose.xlu0.b32.cont [5/16] %v380_v43, 128 }
 0x142   : > { %443 = vxpose.xlu0.b32.cont [6/16] %v385_v45, 128 }
 0x146   : > { %444 = vxpose.xlu0.b32.cont [7/16] %v390_v47, 128 }
 0x14a   : > { %445 = vxpose.xlu0.b32.cont [8/16] %v395_v49, 128 }
 0x14e   : > { %446 = vxpose.xlu0.b32.cont [9/16] %v400_v51, 128 }
 0x152   : > { %447 = vxpose.xlu0.b32.cont [10/16] %v405_v53, 128 }
 0x156   : > { %448 = vxpose.xlu0.b32.cont [11/16] %v410_v55, 128 }
 0x15a   : > { %449 = vxpose.xlu0.b32.cont [12/16] %v415_v57, 128 }
 0x15e   : > { %450 = vxpose.xlu0.b32.cont [13/16] %v420_v59, 128 }
 0x162   : > { %451 = vxpose.xlu0.b32.cont [14/16] %v425_v61, 128 }
 0x166   : > { %452 = vxpose.xlu0.b32.cont [15/16] %v430_v63, 128 }
 0x16a   : > { %453 = vxpose.xlu0.b32.end [16/16] %v435_v0, 128 }
 0x1aa   : > { %v454_v1 = vpop.trf.xlu0 }
 0x1ab   : > { %470 = vst [vmem:[%s1208_s25] sm:$0xff] %v454_v1 }
 0x1ae   : > { %v455_v2 = vpop.trf.xlu0 }
 0x1af   : > { %471 = vst [vmem:[%s1208_s25 + $0x8] sm:$0xff] %v455_v2 }
 0x1b2   : > { %v456_v3 = vpop.trf.xlu0 }
 0x1b3   : > { %472 = vst [vmem:[%s1208_s25 + $0x10] sm:$0xff] %v456_v3 }
 0x1b6   : > { %v457_v4 = vpop.trf.xlu0 }
 0x1b7   : > { %473 = vst [vmem:[%s1208_s25 + $0x18] sm:$0xff] %v457_v4 }
 0x1ba   : > { %v458_v5 = vpop.trf.xlu0 }
 0x1bb   : > { %474 = vst [vmem:[%s1208_s25 + $0x20] sm:$0xff] %v458_v5 }
 0x1be   : > { %v459_v6 = vpop.trf.xlu0 }
 0x1bf   : > { %475 = vst [vmem:[%s1208_s25 + $0x28] sm:$0xff] %v459_v6 }
 0x1c2   : > { %v460_v7 = vpop.trf.xlu0 }
 0x1c3   : > { %476 = vst [vmem:[%s1208_s25 + $0x30] sm:$0xff] %v460_v7 }
 0x1c6   : > { %v461_v8 = vpop.trf.xlu0 }
 0x1c7   : > { %477 = vst [vmem:[%s1208_s25 + $0x38] sm:$0xff] %v461_v8 }
 0x1ca   : > { %v462_v9 = vpop.trf.xlu0 }
 0x1cb   : > { %478 = vst [vmem:[%s1208_s25 + $0x40] sm:$0xff] %v462_v9 }
 0x1ce   : > { %v463_v10 = vpop.trf.xlu0 }
 0x1cf   : > { %479 = vst [vmem:[%s1208_s25 + $0x48] sm:$0xff] %v463_v10 }
 0x1d2   : > { %v464_v11 = vpop.trf.xlu0 }
 0x1d3   : > { %480 = vst [vmem:[%s1208_s25 + $0x50] sm:$0xff] %v464_v11 }
 0x1d6   : > { %v465_v12 = vpop.trf.xlu0 }
 0x1d7   : > { %481 = vst [vmem:[%s1208_s25 + $0x58] sm:$0xff] %v465_v12 }
 0x1da   : > { %v466_v13 = vpop.trf.xlu0 }
 0x1db   : > { %482 = vst [vmem:[%s1208_s25 + $0x60] sm:$0xff] %v466_v13 }
 0x1de   : > { %v467_v14 = vpop.trf.xlu0 }
 0x1df   : > { %483 = vst [vmem:[%s1208_s25 + $0x68] sm:$0xff] %v467_v14 }
 0x1e2   : > { %v468_v15 = vpop.trf.xlu0 }
 0x1e3   : > { %484 = vst [vmem:[%s1208_s25 + $0x70] sm:$0xff] %v468_v15 }
 0x1e6   : > { %v469_v16 = vpop.trf.xlu0 }
 0x1e7   : > { %485 = vst [vmem:[%s1208_s25 + $0x78] sm:$0xff] %v469_v16 }
 0x1e8   : > { %923 = shalt.err (!%p920_p5)
}
 0x1e9   : > { %s924_s12 = scalar_lea.hbm %s1231_s29, 2048  ;;  %s928_s27 = scalar_lea.hbm %s1290_s3, 8192 }
 0x1ea   : > { %p925_p4 = scmp.ne.s32.totalorder %s1231_s29, %s924_s12  ;;  %p929_p9 = scmp.lt.s32.totalorder %s1231_s29, %s1290_s3 }
 0x1eb   : > { %p930_p10 = scmp.lt.s32.totalorder %s928_s27, %s924_s12 }
 0x1ec   : > { %p926_p6 = pnand %p925_p4, %p1131_p11 }
 0x1ed   : > { %p931_p12 = por %p930_p10, %p929_p9 }
 0x1ee   : > { %p927_p7 = pneg %p926_p6 }
 0x1f0   : > { %p932_p1 = pnand %p931_p12, %p927_p7 }
 0x1f2   : > { %935 = shalt.err (!%p932_p1)
}
 0x1f3   : > { %s1017_s24 = smov 128   ;;  %s1018_s25 = smov 256  }
 0x1f4   : > { %s1019_s26 = smov 8  }
 0x1f5   : > { %768 = dma.vmem_to_hbm [thread:$0]  (%p1131_p11), %s1233_s6, 2048, %s1231_s29, %s487_s16, %s1017_s24, %s1018_s25, %s1019_s26  }
 0x1f6 PF: > { %s1315_s30 = sld [smem:[#allocation11_spill]]  ;;  %p785_p8 = scmp.ge.s32.totalorder %s1010_s19, 2 }
 0x1f7   : > { %s1316_s23 = sld [smem:[#allocation13_spill]] }
 0x1fc   : > { %s519_s10 = sand.u32 1, %s1315_s30  }
 0x1fd   : > { %p1317_p13 = scmp.ne.s32.totalorder %s1316_s23, 0  ;;  %s520_s28 = scalar_lea.sflag [#allocation4], %s519_s10 }
 0x1ff   : > { %p779_p2 = pnand %p785_p8, %p1317_p13 }
 0x201   : > { %p780_p0 = pneg %p779_p2 }
 0x203   : > { %977 = dma.done.wait (%p780_p0), %s520_s28, 2048  }
 0x204   : > { %979 = vsyncadd (%p780_p0), %s520_s28, 4294965248  ;;  %s20_s19 = sadd.s32 1, %s1010_s19   ;;  %s1318_s15 = sld [smem:[#allocation12_spill]] }
 0x205   : > { %p17_p3 = scmp.ge.s32.totalorder %s20_s19, 6   ;;  %s1319_s17 = sld [smem:[#allocation14_spill]] }
 0x206   : > { %s1320_s12 = smov %s986_s13  ;;  %s1321_s13 = smov %s990_s14 }
 0x207   : > { %s1322_s14 = smov %s1148_s4  ;;  %s1323_s16 = smov %s1006_s18 }
 0x208   : > { %s1324_s18 = smov %s1330_s8  ;;  %19 = sbr.rel (!%p17_p3) target bundleno = 10 (0xa), region = 85 }
 0x20d   :  { %525 = vsyncpa [#allocation3], 1 }
 0x20e   :  { %527 = vsyncpa [#allocation3 + $0x1], 1 }
 0x20f   :  { %528 = vsyncpa [#allocation6], 1 }
 0x210   :  { %529 = vsyncpa [#allocation4], 1 }
 0x211   :  { %531 = vsyncpa [#allocation4 + $0x1], 1 }

</bundles_post_ra>
